<compile_context>
chip_gen: v5e
topology: v5e:2x2
jax: 0.10.0
libtpu: 0.0.40
codegen_flags: <defaults>
</compile_context>

<pallas_src>
import math

import jax
import jax.numpy as jnp
from jax.experimental import pallas as pl
from jax.experimental.pallas import tpu as pltpu


# ----------------------------- config (static) -----------------------------
B = 2           # batch
S = 8           # sequence length
H = 32          # hidden_size
NH = 4          # num_heads
HD = H // NH    # head_size
BS = B * S      # flattened batch*seq rows
SCALE = 1.0 / math.sqrt(HD)


# ----------------------------- kernel -----------------------------
def self_attention_kernel(x_ref, wqk_ref, bqk_ref, y_ref):
    # x_ref: (B*S, H); wqk_ref: (H, 2H) = [Wq*SCALE | Wk]; bqk_ref: (1, 2H)
    x = x_ref[...]                                                  # (16, 32)

    # Fused Q/K projection: one MXU GEMM (scale already folded into Wq/bq).
    qk = jnp.dot(x, wqk_ref[...], preferred_element_type=jnp.float32) + bqk_ref[...]
    q = qk[:, :H]                # already includes 1/sqrt(HD)
    k = qk[:, H:]                # PyTorch source quirk: value_states = self.key(x)
                                 # -> v == k; dropout(p=0.0) on probs is identity.

    # Stack per-(batch, head) tiles into a single batched operand (B*NH, S, HD).
    q_heads = jnp.stack(
        [q[b * S:(b + 1) * S, h * HD:(h + 1) * HD]
         for b in range(B) for h in range(NH)], axis=0)             # (8, 8, 8)
    k_heads = jnp.stack(
        [k[b * S:(b + 1) * S, h * HD:(h + 1) * HD]
         for b in range(B) for h in range(NH)], axis=0)             # (8, 8, 8)

    # Batched QK^T: contract the head dim of both operands (no explicit .T).
    s = jnp.einsum('bqd,bkd->bqk', q_heads, k_heads,
                   preferred_element_type=jnp.float32)              # (8, 8, 8)

    # One batched softmax for all (batch, head) pairs.
    m = jnp.max(s, axis=-1, keepdims=True)
    e = jnp.exp(s - m)
    denom = jnp.sum(e, axis=-1, keepdims=True)
    p = e * pl.reciprocal(denom, approx=False)                      # exact

    # Batched PV with v == k.
    ctx = jnp.einsum('bqk,bkd->bqd', p, k_heads,
                     preferred_element_type=jnp.float32)            # (8, 8, 8)

    # Reassemble (B*NH, S, HD) -> (B*S, H).
    y = jnp.concatenate(
        [jnp.concatenate([ctx[b * NH + h] for h in range(NH)], axis=-1)
         for b in range(B)],
        axis=0)                                                     # (16, 32)
    y_ref[...] = y.astype(y_ref.dtype)


# ----------------------------- param prep (once, at init) -----------------------------
def prepare_params(params):
    """One-time fusion: [Wq*scale | Wk] -> (H, 2H), [bq*scale, bk] -> (1, 2H)."""
    wqk = jnp.concatenate([params["wq"] * SCALE, params["wk"]], axis=1)        # (H, 2H)
    bqk = jnp.concatenate([params["bq"] * SCALE, params["bk"]], axis=0)
    return {"wqk": wqk, "bqk": bqk.reshape(1, 2 * H)}


# ----------------------------- wrapper -----------------------------
def trans_self_attention(x, fused):
    """x: (B, S, H) float32.  fused: dict with pre-fused 'wqk' (H,2H), 'bqk' (1,2H)."""
    x2 = x.reshape(BS, H)                       # free metadata reshape, lane-friendly 2-D

    vmem = pltpu.MemorySpace.VMEM
    y2 = pl.pallas_call(
        self_attention_kernel,
        out_shape=jax.ShapeDtypeStruct((BS, H), jnp.float32),
        in_specs=[
            pl.BlockSpec(memory_space=vmem),    # x (whole array, single invocation)
            pl.BlockSpec(memory_space=vmem),    # fused Wqk (scale folded)
            pl.BlockSpec(memory_space=vmem),    # fused bqk (2-D)
        ],
        out_specs=pl.BlockSpec(memory_space=vmem),
    )(x2, fused["wqk"], fused["bqk"])

    return y2.reshape(B, S, H)


# ----------------------------- reference (plain JAX) -----------------------------
def trans_self_attention_ref(x, p):
    q = x @ p["wq"] + p["bq"]
    k = x @ p["wk"] + p["bk"]
    v = k  # same quirk as the PyTorch source

    def split(t):  # (B,S,H) -> (B,NH,S,HD)
        return t.reshape(B, S, NH, HD).transpose(0, 2, 1, 3)

    qh, kh, vh = split(q), split(k), split(v)
    scores = (qh @ kh.transpose(0, 1, 3, 2)) / math.sqrt(HD)
    probs = jax.nn.softmax(scores, axis=-1)
    ctx = (probs @ vh).transpose(0, 2, 1, 3).reshape(B, S, H)
    return ctx


# ----------------------------- param init -----------------------------
def init_params(key):
    init_range = 0.02
    keys = jax.random.split(key, 3)

    def lin(k, d_in, d_out):
        # stored so that y = x @ W + b (PyTorch weight transposed)
        return (init_range * jax.random.normal(k, (d_in, d_out), jnp.float32),
                0.01 * jnp.ones((d_out,), jnp.float32))

    wq, bq = lin(keys[0], H, H)
    wk, bk = lin(keys[1], H, H)
    # `value` Linear exists in the module but is unused on the encoder path.
    _wv, _bv = lin(keys[2], H, H)
    return dict(wq=wq, bq=bq, wk=wk, bk=bk)


if __name__ == "__main__":
    key = jax.random.PRNGKey(0)
    kx, kp = jax.random.split(key)
    x = jax.random.normal(kx, (B, S, H), jnp.float32)
    params = init_params(kp)
    fused = jax.block_until_ready(prepare_params(params))   # once, at init

    y = trans_self_attention(x, fused)
    y = jax.block_until_ready(y)

    y_ref = trans_self_attention_ref(x, params)
    err = float(jnp.max(jnp.abs(y - y_ref)))
    assert err < 1e-4, f"mismatch vs reference: {err}"

    print("KERNEL_OK")
</pallas_src>

<mosaic_0001>
module attributes {stable_mosaic.version = 11 : i64} {
  func.func @self_attention_kernel(%arg0: memref<16x32xf32, #tpu.memory_space<vmem>>, %arg1: memref<32x64xf32, #tpu.memory_space<vmem>>, %arg2: memref<1x64xf32, #tpu.memory_space<vmem>>, %arg3: memref<16x32xf32, #tpu.memory_space<vmem>>) attributes {dimension_semantics = [], scalar_prefetch = 0 : i64, scratch_operands = 0 : i64, tpu.core_type = #tpu.core_type<tc>} {
    %c0 = arith.constant 0 : index
    %c0_0 = arith.constant 0 : index
    %0 = vector.load %arg0[%c0, %c0_0] : memref<16x32xf32, #tpu.memory_space<vmem>>, vector<16x32xf32>
    %c0_1 = arith.constant 0 : index
    %c0_2 = arith.constant 0 : index
    %1 = vector.load %arg1[%c0_1, %c0_2] : memref<32x64xf32, #tpu.memory_space<vmem>>, vector<32x64xf32>
    %cst = arith.constant dense<0.000000e+00> : vector<16x64xf32>
    %2 = tpu.matmul %0, %1, %cst {dimension_numbers = #tpu.dot_dimension_numbers<[1], [0], [0], [1], [0, 0, 1, 1], [], []>} : vector<16x32xf32>, vector<32x64xf32>, vector<16x64xf32> -> vector<16x64xf32>
    %c0_3 = arith.constant 0 : index
    %c0_4 = arith.constant 0 : index
    %3 = vector.load %arg2[%c0_3, %c0_4] : memref<1x64xf32, #tpu.memory_space<vmem>>, vector<1x64xf32>
    %4 = vector.broadcast %3 : vector<1x64xf32> to vector<16x64xf32>
    %5 = arith.addf %2, %4 : vector<16x64xf32>
    %6 = vector.extract_strided_slice %5 {offsets = [0, 0], sizes = [16, 32], strides = [1, 1]} : vector<16x64xf32> to vector<16x32xf32>
    %7 = vector.extract_strided_slice %5 {offsets = [0, 32], sizes = [16, 32], strides = [1, 1]} : vector<16x64xf32> to vector<16x32xf32>
    %8 = vector.extract_strided_slice %6 {offsets = [0, 0], sizes = [8, 8], strides = [1, 1]} : vector<16x32xf32> to vector<8x8xf32>
    %9 = vector.extract_strided_slice %6 {offsets = [0, 8], sizes = [8, 8], strides = [1, 1]} : vector<16x32xf32> to vector<8x8xf32>
    %10 = vector.extract_strided_slice %6 {offsets = [0, 16], sizes = [8, 8], strides = [1, 1]} : vector<16x32xf32> to vector<8x8xf32>
    %11 = vector.extract_strided_slice %6 {offsets = [0, 24], sizes = [8, 8], strides = [1, 1]} : vector<16x32xf32> to vector<8x8xf32>
    %12 = vector.extract_strided_slice %6 {offsets = [8, 0], sizes = [8, 8], strides = [1, 1]} : vector<16x32xf32> to vector<8x8xf32>
    %13 = vector.extract_strided_slice %6 {offsets = [8, 8], sizes = [8, 8], strides = [1, 1]} : vector<16x32xf32> to vector<8x8xf32>
    %14 = vector.extract_strided_slice %6 {offsets = [8, 16], sizes = [8, 8], strides = [1, 1]} : vector<16x32xf32> to vector<8x8xf32>
    %15 = vector.extract_strided_slice %6 {offsets = [8, 24], sizes = [8, 8], strides = [1, 1]} : vector<16x32xf32> to vector<8x8xf32>
    %16 = vector.shape_cast %8 : vector<8x8xf32> to vector<1x8x8xf32>
    %17 = vector.shape_cast %9 : vector<8x8xf32> to vector<1x8x8xf32>
    %18 = vector.shape_cast %10 : vector<8x8xf32> to vector<1x8x8xf32>
    %19 = vector.shape_cast %11 : vector<8x8xf32> to vector<1x8x8xf32>
    %20 = vector.shape_cast %12 : vector<8x8xf32> to vector<1x8x8xf32>
    %21 = vector.shape_cast %13 : vector<8x8xf32> to vector<1x8x8xf32>
    %22 = vector.shape_cast %14 : vector<8x8xf32> to vector<1x8x8xf32>
    %23 = vector.shape_cast %15 : vector<8x8xf32> to vector<1x8x8xf32>
    %24 = tpu.concatenate %16, %17, %18, %19, %20, %21, %22, %23 in 0 : vector<1x8x8xf32>, vector<1x8x8xf32>, vector<1x8x8xf32>, vector<1x8x8xf32>, vector<1x8x8xf32>, vector<1x8x8xf32>, vector<1x8x8xf32>, vector<1x8x8xf32> -> vector<8x8x8xf32>
    %25 = vector.extract_strided_slice %7 {offsets = [0, 0], sizes = [8, 8], strides = [1, 1]} : vector<16x32xf32> to vector<8x8xf32>
    %26 = vector.extract_strided_slice %7 {offsets = [0, 8], sizes = [8, 8], strides = [1, 1]} : vector<16x32xf32> to vector<8x8xf32>
    %27 = vector.extract_strided_slice %7 {offsets = [0, 16], sizes = [8, 8], strides = [1, 1]} : vector<16x32xf32> to vector<8x8xf32>
    %28 = vector.extract_strided_slice %7 {offsets = [0, 24], sizes = [8, 8], strides = [1, 1]} : vector<16x32xf32> to vector<8x8xf32>
    %29 = vector.extract_strided_slice %7 {offsets = [8, 0], sizes = [8, 8], strides = [1, 1]} : vector<16x32xf32> to vector<8x8xf32>
    %30 = vector.extract_strided_slice %7 {offsets = [8, 8], sizes = [8, 8], strides = [1, 1]} : vector<16x32xf32> to vector<8x8xf32>
    %31 = vector.extract_strided_slice %7 {offsets = [8, 16], sizes = [8, 8], strides = [1, 1]} : vector<16x32xf32> to vector<8x8xf32>
    %32 = vector.extract_strided_slice %7 {offsets = [8, 24], sizes = [8, 8], strides = [1, 1]} : vector<16x32xf32> to vector<8x8xf32>
    %33 = vector.shape_cast %25 : vector<8x8xf32> to vector<1x8x8xf32>
    %34 = vector.shape_cast %26 : vector<8x8xf32> to vector<1x8x8xf32>
    %35 = vector.shape_cast %27 : vector<8x8xf32> to vector<1x8x8xf32>
    %36 = vector.shape_cast %28 : vector<8x8xf32> to vector<1x8x8xf32>
    %37 = vector.shape_cast %29 : vector<8x8xf32> to vector<1x8x8xf32>
    %38 = vector.shape_cast %30 : vector<8x8xf32> to vector<1x8x8xf32>
    %39 = vector.shape_cast %31 : vector<8x8xf32> to vector<1x8x8xf32>
    %40 = vector.shape_cast %32 : vector<8x8xf32> to vector<1x8x8xf32>
    %41 = tpu.concatenate %33, %34, %35, %36, %37, %38, %39, %40 in 0 : vector<1x8x8xf32>, vector<1x8x8xf32>, vector<1x8x8xf32>, vector<1x8x8xf32>, vector<1x8x8xf32>, vector<1x8x8xf32>, vector<1x8x8xf32>, vector<1x8x8xf32> -> vector<8x8x8xf32>
    "tpu.trace_start"() <{level = 10 : i32, message = "bqd,bkd->bqk"}> : () -> ()
    %cst_5 = arith.constant dense<0.000000e+00> : vector<8x8x8xf32>
    %42 = tpu.matmul %24, %41, %cst_5 {dimension_numbers = #tpu.dot_dimension_numbers<[2], [2], [1], [1], [0, 0, 0, 1, 1, 1], [0], [0]>} : vector<8x8x8xf32>, vector<8x8x8xf32>, vector<8x8x8xf32> -> vector<8x8x8xf32>
    "tpu.trace_stop"() : () -> ()
    %cst_6 = arith.constant dense<0xFF800000> : vector<8x8xf32>
    %43 = vector.multi_reduction <maximumf>, %42, %cst_6 [2] : vector<8x8x8xf32> to vector<8x8xf32>
    %44 = vector.shape_cast %43 : vector<8x8xf32> to vector<8x8x1xf32>
    %45 = vector.broadcast %44 : vector<8x8x1xf32> to vector<8x8x8xf32>
    %46 = arith.subf %42, %45 : vector<8x8x8xf32>
    %47 = math.exp %46 : vector<8x8x8xf32>
    %cst_7 = arith.constant dense<0.000000e+00> : vector<8x8xf32>
    %48 = vector.multi_reduction <add>, %47, %cst_7 [2] : vector<8x8x8xf32> to vector<8x8xf32>
    %49 = vector.shape_cast %48 : vector<8x8xf32> to vector<8x8x1xf32>
    %50 = tpu.reciprocal %49 : vector<8x8x1xf32> -> vector<8x8x1xf32>
    %51 = vector.broadcast %50 : vector<8x8x1xf32> to vector<8x8x8xf32>
    %52 = arith.mulf %47, %51 : vector<8x8x8xf32>
    "tpu.trace_start"() <{level = 10 : i32, message = "bqk,bkd->bqd"}> : () -> ()
    %cst_8 = arith.constant dense<0.000000e+00> : vector<8x8x8xf32>
    %53 = tpu.matmul %52, %41, %cst_8 {dimension_numbers = #tpu.dot_dimension_numbers<[2], [1], [1], [2], [0, 0, 0, 1, 1, 2], [0], [0]>} : vector<8x8x8xf32>, vector<8x8x8xf32>, vector<8x8x8xf32> -> vector<8x8x8xf32>
    "tpu.trace_stop"() : () -> ()
    %54 = vector.extract_strided_slice %53 {offsets = [0, 0, 0], sizes = [1, 8, 8], strides = [1, 1, 1]} : vector<8x8x8xf32> to vector<1x8x8xf32>
    %55 = vector.shape_cast %54 : vector<1x8x8xf32> to vector<8x8xf32>
    %56 = vector.extract_strided_slice %53 {offsets = [1, 0, 0], sizes = [1, 8, 8], strides = [1, 1, 1]} : vector<8x8x8xf32> to vector<1x8x8xf32>
    %57 = vector.shape_cast %56 : vector<1x8x8xf32> to vector<8x8xf32>
    %58 = vector.extract_strided_slice %53 {offsets = [2, 0, 0], sizes = [1, 8, 8], strides = [1, 1, 1]} : vector<8x8x8xf32> to vector<1x8x8xf32>
    %59 = vector.shape_cast %58 : vector<1x8x8xf32> to vector<8x8xf32>
    %60 = vector.extract_strided_slice %53 {offsets = [3, 0, 0], sizes = [1, 8, 8], strides = [1, 1, 1]} : vector<8x8x8xf32> to vector<1x8x8xf32>
    %61 = vector.shape_cast %60 : vector<1x8x8xf32> to vector<8x8xf32>
    %62 = tpu.concatenate %55, %57, %59, %61 in 1 : vector<8x8xf32>, vector<8x8xf32>, vector<8x8xf32>, vector<8x8xf32> -> vector<8x32xf32>
    %63 = vector.extract_strided_slice %53 {offsets = [4, 0, 0], sizes = [1, 8, 8], strides = [1, 1, 1]} : vector<8x8x8xf32> to vector<1x8x8xf32>
    %64 = vector.shape_cast %63 : vector<1x8x8xf32> to vector<8x8xf32>
    %65 = vector.extract_strided_slice %53 {offsets = [5, 0, 0], sizes = [1, 8, 8], strides = [1, 1, 1]} : vector<8x8x8xf32> to vector<1x8x8xf32>
    %66 = vector.shape_cast %65 : vector<1x8x8xf32> to vector<8x8xf32>
    %67 = vector.extract_strided_slice %53 {offsets = [6, 0, 0], sizes = [1, 8, 8], strides = [1, 1, 1]} : vector<8x8x8xf32> to vector<1x8x8xf32>
    %68 = vector.shape_cast %67 : vector<1x8x8xf32> to vector<8x8xf32>
    %69 = vector.extract_strided_slice %53 {offsets = [7, 0, 0], sizes = [1, 8, 8], strides = [1, 1, 1]} : vector<8x8x8xf32> to vector<1x8x8xf32>
    %70 = vector.shape_cast %69 : vector<1x8x8xf32> to vector<8x8xf32>
    %71 = tpu.concatenate %64, %66, %68, %70 in 1 : vector<8x8xf32>, vector<8x8xf32>, vector<8x8xf32>, vector<8x8xf32> -> vector<8x32xf32>
    %72 = tpu.concatenate %62, %71 in 0 : vector<8x32xf32>, vector<8x32xf32> -> vector<16x32xf32>
    %c0_9 = arith.constant 0 : index
    %c0_10 = arith.constant 0 : index
    %73 = vector.load %arg3[%c0_9, %c0_10] : memref<16x32xf32, #tpu.memory_space<vmem>>, vector<16x32xf32>
    tpu.vector_store %arg3[%c0_9, %c0_10], %72 {strides = array<i32>} : memref<16x32xf32, #tpu.memory_space<vmem>>, vector<16x32xf32>,
    return
  }
}

</mosaic_0001>

<bundles_post_ra>
// kernel: tpu_custom_call.1
= control target key start
LH: loop header
LB: loop body
LE: loop exit
PB: predicated region body
PF: predicated region fallthrough
CT: control target
= control target key end

     0   :  { %8 = vsyncpa [#allocation3], 0  ;;  %s1039_s0 = inlined_call_operand.hbm [shape: f32[16,32], index: 0, kind: input, shape index: {}]   ;;  %s1040_s1 = inlined_call_operand.hbm [shape: f32[32,64], index: 1, kind: input, shape index: {}]   ;;  %s1041_s2 = inlined_call_operand.vmem [shape: f32[1,64], index: 2, kind: input, shape index: {}]   ;;  %s1042_s3 = inlined_call_operand.hbm [shape: f32[16,32], index: 3, kind: output, shape index: {}]  }
   0x1   :  { %9 = vsyncpa [#allocation6], 0 }
   0x2   :  { %10 = vsyncpa [#allocation4], 0  ;;  %s15_s14 = sshll.u32 %s1039_s0, 4  ;;  %s896_s15 = smov [#allocation2]   ;;  %s16_s14 = int_to_ptr.hbm [resolvable:$true] %s15_s14 }
   0x3   :  { %s17_s16 = sshll.u32 %s896_s15, 4  ;;  %s28_s19 = sshll.u32 %s1040_s1, 4  ;;  %s18_s16 = int_to_ptr.vmem [resolvable:$true] %s17_s16  ;;  %s29_s19 = int_to_ptr.hbm [resolvable:$true] %s28_s19 }
   0x4   :  { %s897_s20 = smov 128   ;;  %s898_s21 = smov 8  }
   0x5   :  { %23 = dma.hbm_to_vmem [thread:$0]  %s16_s14, 256, %s18_s16, [#allocation3], %s897_s20, %s897_s20, %s898_s21  }
   0x6   :  { %s899_s22 = smov [#allocation5]  }
   0x7   :  { %s30_s23 = sshll.u32 %s899_s22, 4  ;;  %s31_s23 = int_to_ptr.vmem [resolvable:$true] %s30_s23 }
   0x8   :  { %36 = dma.hbm_to_vmem [thread:$0]  %s29_s19, 512, %s31_s23, [#allocation6], %s897_s20, %s897_s20, %s898_s21  }
   0x9   :  { %890 = dma.done.wait [#allocation3], 256  }
   0xa   :  { %891 = vsyncadd [#allocation3], 4294967040 }
   0xb   :  { %892 = dma.done.wait [#allocation6], 512  }
   0xc   :  { %893 = vsyncadd [#allocation6], 4294966784  ;;  %v52_v0 = vld [vmem:[#allocation5 + $0x18] sm:$0xff]  ;;  %v51_v1 = vld [vmem:[#allocation5 + $0x10] sm:$0xff]  ;;  %vm57_vm0 = vcmask 261120   ;;  %s900_s24 = smov 104  }
   0xd   :  { %76 = vmatpush.msra.mxu0 %v52_v0  ;;  %v50_v2 = vld [vmem:[#allocation5 + $0x8] sm:$0xff]  ;;  %v49_v3 = vld [vmem:[#allocation5] sm:$0xff]  ;;  %v47_v4 = vld [vmem:[#allocation2] sm:$0xff]  ;;  %s901_s25 = smov 120   ;;  %s902_s26 = smov 112   ;;  %vm103_vm1 = vcmask 64512  }
   0xe   :  { %v48_v5 = vld [vmem:[#allocation2 + $0x8] sm:$0xff]  ;;  %v785_v6 = vld [vmem:[%s1041_s2] ss:$0 sm:$0xff]  ;;  %s903_s27 = smov 96   ;;  %s904_s2 = smov 24  }
   0xf   :  { %77 = vmatpush.msra.mxu0 %v51_v1  ;;  %s905_s28 = smov 16   ;;  %s906_s29 = smov [#allocation7]  }
  0x10   :  { %s732_s30 = sshll.u32 %s906_s29, 4  ;;  %s734_s6 = sshll.u32 %s1042_s3, 4  ;;  %s733_s30 = int_to_ptr.vmem [resolvable:$true] %s732_s30  ;;  %s735_s6 = int_to_ptr.hbm [resolvable:$true] %s734_s6 }
  0x11   :  { %78 = vmatpush.msra.mxu0 %v50_v2 }
  0x13   :  { %79 = vmatpush.msra.mxu0 %v49_v3 }
  0x14   :  { %748 = vmatmul.msk.f32.vlgmr.msra.gmra.mxu0 %vm57_vm0, %v47_v4 }
  0x1c   :  { %749 = vmatmul.msk.f32.gmra.mxu0 %vm57_vm0, %v48_v5 }
  0x91   :  { %v81_v7 = vpop.f32.mrf.mxu0 }
  0x92   :  { %v82_v8 = vadd.f32 %v785_v6, %v81_v7 }
  0x94   :  { %92 = vrot.lane.b32.xlu1 %v82_v8, %s900_s24  ;;  %88 = vrot.lane.b32.xlu0 %v82_v8, %s901_s25 }
  0x99   :  { %v84_v9 = vpop.f32.mrf.mxu0 }
  0x9a   :  { %v85_v10 = vadd.f32 %v785_v6, %v84_v9 }
  0x9c   :  { %99 = vrot.lane.b32.xlu1 %v85_v10, %s900_s24  ;;  %90 = vrot.lane.b32.xlu0 %v82_v8, %s902_s26 }
  0x9d   :  { %95 = vrot.lane.b32.xlu2 %v85_v10, %s901_s25 }
  0xa4   :  { %101 = vrot.lane.b32.xlu1 %v82_v8, %s903_s27 }
  0xa5   :  { %97 = vrot.lane.b32.xlu2 %v85_v10, %s902_s26 }
  0xad   :  { %206 = vrot.lane.b32.xlu2 %v85_v10, %s903_s27 }
  0xf7   :  { %v96_v11 = vpop.permute.xlu2 %95 }
  0xff   :  { %v98_v14 = vpop.permute.xlu2 %97 }
 0x106   :  { %v93_v12 = vpop.permute.xlu1 %92  ;;  %v89_v13 = vpop.permute.xlu0 %88 }
 0x107   :  { %180 = vrot.lane.b32.xlu1 %v93_v12, %s903_s27  ;;  %128 = vrot.lane.b32.xlu0 %v89_v13, %s903_s27  ;;  %v207_v18 = vpop.permute.xlu2 %206 }
 0x10e   :  { %v100_v15 = vpop.permute.xlu1 %99  ;;  %v91_v16 = vpop.permute.xlu0 %90 }
 0x10f   :  { %258 = vrot.lane.b32.xlu1 %v98_v14, %s903_s27  ;;  %154 = vrot.lane.b32.xlu0 %v91_v16, %s903_s27 }
 0x110   :  { %284 = vrot.lane.b32.xlu2 %v100_v15, %s903_s27 }
 0x116   :  { %v102_v17 = vpop.permute.xlu1 %101 }
 0x117   :  { %750 = vmatpush.xpose.msk.msra.mxu1 %vm103_vm1, %v102_v17  ;;  %232 = vrot.lane.b32.xlu0 %v96_v11, %s903_s27 }
 0x11a   :  { %751 = vmatmul.msk.f32.vlgmr.msra.gmra.mxu1 %vm103_vm1, %v82_v8 }
 0x16a   :  { %v285_v21 = vpop.permute.xlu2 %284 }
 0x179   :  { %v181_v19 = vpop.permute.xlu1 %180  ;;  %v129_v20 = vpop.permute.xlu0 %128 }
 0x17a   :  { %752 = vmatpush.xpose.msk.msra.mxu2 %vm103_vm1, %v129_v20  ;;  %756 = vmatpush.xpose.msk.msrb.mxu1 %vm103_vm1, %v181_v19 }
 0x17b   :  { %545 = vmatpush.msrb.mxu0 %v129_v20 }
 0x17d   :  { %753 = vmatmul.msk.f32.vlgmr.msra.gmra.mxu2 %vm103_vm1, %v89_v13  ;;  %757 = vmatmul.msk.f32.vlgmr.msrb.gmra.mxu1 %vm103_vm1, %v93_v12 }
 0x17e   :  { %758 = vmatpush.xpose.msk.msrb.mxu2 %vm103_vm1, %v207_v18 }
 0x181   :  { %v259_v22 = vpop.permute.xlu1 %258  ;;  %v155_v23 = vpop.permute.xlu0 %154 }
 0x182   :  { %764 = vmatpush.xpose.msk.msra.mxu2 %vm103_vm1, %v285_v21  ;;  %754 = vmatpush.xpose.msk.msra.mxu3 %vm103_vm1, %v155_v23 }
 0x183   :  { %762 = vmatpush.xpose.msk.msra.mxu1 %vm103_vm1, %v259_v22 }
 0x185   :  { %755 = vmatmul.msk.f32.vlgmr.msra.gmra.mxu3 %vm103_vm1, %v91_v16  ;;  %759 = vmatmul.msk.f32.vlgmr.msrb.gmra.mxu2 %vm103_vm1, %v85_v10 }
 0x186   :  { %763 = vmatmul.msk.f32.vlgmr.msra.gmra.mxu1 %vm103_vm1, %v98_v14  ;;  %593 = vmatpush.msrb.mxu2 %v181_v19 }
 0x187   :  { %569 = vmatpush.msrb.mxu1 %v155_v23 }
 0x189   :  { %665 = vmatpush.msra.mxu1 %v259_v22  ;;  %v233_v24 = vpop.permute.xlu0 %232 }
 0x18a   :  { %760 = vmatpush.xpose.msk.msrb.mxu3 %vm103_vm1, %v233_v24  ;;  %641 = vmatpush.msra.mxu0 %v233_v24 }
 0x18d   :  { %761 = vmatmul.msk.f32.vlgmr.msrb.gmra.mxu3 %vm103_vm1, %v96_v11  ;;  %765 = vmatmul.msk.f32.vlgmr.msra.gmra.mxu2 %vm103_vm1, %v100_v15 }
 0x18e   :  { %521 = vmatpush.msra.mxu3 %v102_v17  ;;  %689 = vmatpush.msra.mxu2 %v285_v21 }
 0x190   :  { %617 = vmatpush.msrb.mxu3 %v207_v18 }
 0x197   :  { %v125_v25 = vpop.f32.mrf.mxu1 }
 0x198   :  { %v310_v37 = vsel %vm103_vm1, %v125_v25, -inf }
 0x1fa   :  { %v203_v26 = vpop.f32.mrf.mxu1 }
 0x1fb   :  { %v319_v27 = vsel %vm103_vm1, %v203_v26, -inf }
 0x1fc   :  { %320 = vmax.xlane.f32.xlu2 %v319_v27 }
 0x200   :  { %v151_v28 = vpop.f32.mrf.mxu2 }
 0x201   :  { %v313_v29 = vsel %vm103_vm1, %v151_v28, -inf }
 0x202   :  { %314 = vmax.xlane.f32.xlu0 %v313_v29 }
 0x203   :  { %v281_v30 = vpop.f32.mrf.mxu1 }
 0x204   :  { %v328_v33 = vsel %vm103_vm1, %v281_v30, -inf }
 0x208   :  { %v177_v31 = vpop.f32.mrf.mxu3  ;;  %v229_v32 = vpop.f32.mrf.mxu2 }
 0x209   :  { %v316_v34 = vsel %vm103_vm1, %v177_v31, -inf  ;;  %v322_v40 = vsel %vm103_vm1, %v229_v32, -inf }
 0x20a   :  { %329 = vmax.xlane.f32.xlu0 %v328_v33  ;;  %317 = vmax.xlane.f32.xlu1 %v316_v34 }
 0x210   :  { %v307_v35 = vpop.f32.mrf.mxu2  ;;  %v255_v38 = vpop.f32.mrf.mxu3 }
 0x211   :  { %v331_v36 = vsel %vm103_vm1, %v307_v35, -inf  ;;  %v325_v39 = vsel %vm103_vm1, %v255_v38, -inf }
 0x212   :  { %332 = vmax.xlane.f32.xlu2 %v331_v36  ;;  %311 = vmax.xlane.f32.xlu1 %v310_v37 }
 0x21a   :  { %326 = vmax.xlane.f32.xlu2 %v325_v39 }
 0x222   :  { %323 = vmax.xlane.f32.xlu2 %v322_v40 }
 0x26f   :  { %v321_v41 = vpop.xlane.xlu2 %320 }
 0x270   :  { %v337_v42 = vsub.f32 %v203_v26, %v321_v41 }
 0x272   :  { %v348_v43 = vmul.f32 1.442695, %v337_v42 }
 0x274   :  { %786 = vpow2.f32 %v348_v43 }
 0x275   :  { %v315_v44 = vpop.xlane.xlu0 %314 }
 0x276   :  { %v335_v45 = vsub.f32 %v151_v28, %v315_v44 }
 0x278   :  { %v344_v46 = vmul.f32 1.442695, %v335_v45 }
 0x27a   :  { %v968_v47 = vpop.eup %786  ;;  %788 = vpow2.f32 %v344_v46 }
 0x27b   :  { %v367_v48 = vsel %vm103_vm1, %v968_v47, 0.0 }
 0x27c   :  { %368 = vadd.xlane.f32.xlu0 %v367_v48 }
 0x27d   :  { %v318_v49 = vpop.xlane.xlu1 %317  ;;  %v330_v50 = vpop.xlane.xlu0 %329 }
 0x27e   :  { %v336_v51 = vsub.f32 %v177_v31, %v318_v49  ;;  %v340_v54 = vsub.f32 %v281_v30, %v330_v50 }
 0x280   :  { %v972_v52 = vpop.eup %788  ;;  %v346_v53 = vmul.f32 1.442695, %v336_v51  ;;  %v354_v56 = vmul.f32 1.442695, %v340_v54 }
 0x281   :  { %v361_v55 = vsel %vm103_vm1, %v972_v52, 0.0 }
 0x282   :  { %790 = vpow2.f32 %v346_v53  ;;  %362 = vadd.xlane.f32.xlu1 %v361_v55 }
 0x283   :  { %792 = vpow2.f32 %v354_v56 }
 0x285   :  { %v333_v57 = vpop.xlane.xlu2 %332  ;;  %v312_v58 = vpop.xlane.xlu1 %311 }
 0x286   :  { %v341_v59 = vsub.f32 %v307_v35, %v333_v57  ;;  %v334_v62 = vsub.f32 %v125_v25, %v312_v58 }
 0x288   :  { %v976_v60 = vpop.eup %790  ;;  %v356_v61 = vmul.f32 1.442695, %v341_v59  ;;  %v342_v0 = vmul.f32 1.442695, %v334_v62 }
 0x289   :  { %v364_v63 = vsel %vm103_vm1, %v976_v60, 0.0  ;;  %v980_v2 = vpop.eup %792 }
 0x28a   :  { %794 = vpow2.f32 %v356_v61  ;;  %365 = vadd.xlane.f32.xlu2 %v364_v63  ;;  %v376_v7 = vsel %vm103_vm1, %v980_v2, 0.0 }
 0x28b   :  { %796 = vpow2.f32 %v342_v0 }
 0x28d   :  { %v327_v1 = vpop.xlane.xlu2 %326 }
 0x28e   :  { %v339_v3 = vsub.f32 %v255_v38, %v327_v1 }
 0x290   :  { %v982_v4 = vpop.eup %794  ;;  %v352_v5 = vmul.f32 1.442695, %v339_v3 }
 0x291   :  { %v379_v6 = vsel %vm103_vm1, %v982_v4, 0.0  ;;  %v988_v9 = vpop.eup %796 }
 0x292   :  { %798 = vpow2.f32 %v352_v5  ;;  %380 = vadd.xlane.f32.xlu0 %v379_v6  ;;  %377 = vadd.xlane.f32.xlu2 %v376_v7  ;;  %v358_v13 = vsel %vm103_vm1, %v988_v9, 0.0 }
 0x295   :  { %v324_v8 = vpop.xlane.xlu2 %323 }
 0x296   :  { %v338_v10 = vsub.f32 %v229_v32, %v324_v8 }
 0x298   :  { %v990_v11 = vpop.eup %798  ;;  %v350_v12 = vmul.f32 1.442695, %v338_v10 }
 0x299   :  { %v373_v14 = vsel %vm103_vm1, %v990_v11, 0.0 }
 0x29a   :  { %800 = vpow2.f32 %v350_v12  ;;  %359 = vadd.xlane.f32.xlu0 %v358_v13  ;;  %374 = vadd.xlane.f32.xlu1 %v373_v14 }
 0x2a0   :  { %v996_v15 = vpop.eup %800 }
 0x2a1   :  { %v370_v16 = vsel %vm103_vm1, %v996_v15, 0.0 }
 0x2a2   :  { %371 = vadd.xlane.f32.xlu1 %v370_v16 }
 0x2ef   :  { %v369_v17 = vpop.xlane.xlu0 %368 }
 0x2f0   :  { %802 = vrcp.f32 %v369_v17  ;;  %v435_v22 = vand.u32 2147483648, %v369_v17  ;;  %v433_v24 = vand.u32 2147483647, %v369_v17  ;;  %vm429_vm3 = vweird.f32 %v369_v17 }
 0x2f2   :  { %v436_v29 = vor.u32 1.1754944e-38, %v435_v22  ;;  %vm434_vm5 = vcmp.eq.f32.partialorder %v433_v24, 8.507059e+37 }
 0x2f5   :  { %v363_v18 = vpop.xlane.xlu1 %362 }
 0x2f6   :  { %v803_v19 = vpop.eup %802  ;;  %804 = vrcp.f32 %v363_v18  ;;  %v407_v35 = vand.u32 2147483648, %v363_v18  ;;  %vm401_vm7 = vweird.f32 %v363_v18  ;;  %v405_v37 = vand.u32 2147483647, %v363_v18 }
 0x2f7   :  { %v425_v20 = vmul.f32 %v803_v19, %v369_v17  ;;  %vm430_vm2 = vweird.f32 %v803_v19 }
 0x2f8   :  { %vm431_vm4 = vmor %vm429_vm3, %vm430_vm2  ;;  %v408_v43 = vor.u32 1.1754944e-38, %v407_v35  ;;  %vm406_vm9 = vcmp.eq.f32.partialorder %v405_v37, 8.507059e+37 }
 0x2f9   :  { %v426_v21 = vsub.f32 1.0, %v425_v20 }
 0x2fb   :  { %v427_v23 = vmul.f32 %v803_v19, %v426_v21 }
 0x2fc   :  { %v805_v25 = vpop.eup %804 }
 0x2fd   :  { %v428_v26 = vadd.f32 %v803_v19, %v427_v23  ;;  %v397_v27 = vmul.f32 %v805_v25, %v363_v18  ;;  %v366_v28 = vpop.xlane.xlu2 %365  ;;  %vm402_vm6 = vweird.f32 %v805_v25 }
 0x2fe   :  { %806 = vrcp.f32 %v366_v28  ;;  %vm403_vm8 = vmor %vm401_vm7, %vm402_vm6  ;;  %v419_v49 = vand.u32 2147483647, %v366_v28  ;;  %vm415_vm11 = vweird.f32 %v366_v28 }
 0x2ff   :  { %v432_v30 = vsel %vm431_vm4, %v803_v19, %v428_v26  ;;  %v398_v31 = vsub.f32 1.0, %v397_v27 }
 0x300   :  { %v437_v32 = vsel %vm434_vm5, %v436_v29, %v432_v30  ;;  %vm420_vm13 = vcmp.eq.f32.partialorder %v419_v49, 8.507059e+37 }
 0x301   :  { %v399_v33 = vmul.f32 %v805_v25, %v398_v31  ;;  %v497_v34 = vmul.f32 %v968_v47, %v437_v32  ;;  %v421_v47 = vand.u32 2147483648, %v366_v28 }
 0x303   :  { %v400_v36 = vadd.f32 %v805_v25, %v399_v33  ;;  %769 = vmatmul.msk.f32.vlgmr.msrb.gmra.mxu2 %vm103_vm1, %v497_v34  ;;  %v422_v55 = vor.u32 1.1754944e-38, %v421_v47 }
 0x304   :  { %v807_v38 = vpop.eup %806 }
 0x305   :  { %v411_v39 = vmul.f32 %v807_v38, %v366_v28  ;;  %v378_v40 = vpop.xlane.xlu2 %377  ;;  %v381_v41 = vpop.xlane.xlu0 %380  ;;  %v404_v42 = vsel %vm403_vm8, %v805_v25, %v400_v36  ;;  %vm416_vm10 = vweird.f32 %v807_v38 }
 0x306   :  { %808 = vrcp.f32 %v378_v40  ;;  %v409_v45 = vsel %vm406_vm9, %v408_v43, %v404_v42  ;;  %vm417_vm12 = vmor %vm415_vm11, %vm416_vm10  ;;  %v475_v1 = vand.u32 2147483647, %v378_v40  ;;  %v491_v3 = vand.u32 2147483648, %v381_v41 }
 0x307   :  { %v412_v44 = vsub.f32 1.0, %v411_v39  ;;  %810 = vrcp.f32 %v381_v41  ;;  %v495_v48 = vmul.f32 %v972_v52, %v409_v45  ;;  %v477_v52 = vand.u32 2147483648, %v378_v40 }
 0x308   :  { %v489_v6 = vand.u32 2147483647, %v381_v41  ;;  %vm471_vm2 = vweird.f32 %v378_v40  ;;  %vm485_vm4 = vweird.f32 %v381_v41  ;;  %vm476_vm5 = vcmp.eq.f32.partialorder %v475_v1, 8.507059e+37 }
 0x309   :  { %v413_v46 = vmul.f32 %v807_v38, %v412_v44  ;;  %767 = vmatmul.msk.f32.vlgmr.msrb.gmra.mxu0 %vm103_vm1, %v495_v48  ;;  %v478_v12 = vor.u32 1.1754944e-38, %v477_v52  ;;  %v492_v16 = vor.u32 1.1754944e-38, %v491_v3 }
 0x30a   :  { %vm490_vm7 = vcmp.eq.f32.partialorder %v489_v6, 8.507059e+37 }
 0x30b   :  { %v414_v50 = vadd.f32 %v807_v38, %v413_v46 }
 0x30c   :  { %v809_v51 = vpop.eup %808 }
 0x30d   :  { %v811_v53 = vpop.eup %810  ;;  %v418_v54 = vsel %vm417_vm12, %v807_v38, %v414_v50  ;;  %v467_v56 = vmul.f32 %v809_v51, %v378_v40  ;;  %v375_v57 = vpop.xlane.xlu1 %374  ;;  %vm472_vm14 = vweird.f32 %v809_v51 }
 0x30e   :  { %v1004_v58 = vpop.xlane.xlu0 %359  ;;  %v481_v59 = vmul.f32 %v811_v53, %v381_v41  ;;  %812 = vrcp.f32 %v375_v57  ;;  %v423_v61 = vsel %vm420_vm13, %v422_v55, %v418_v54  ;;  %vm486_vm15 = vweird.f32 %v811_v53  ;;  %vm473_vm3 = vmor %vm471_vm2, %vm472_vm14 }
 0x30f   :  { %v468_v62 = vsub.f32 1.0, %v467_v56  ;;  %814 = vrcp.f32 %v1004_v58  ;;  %v496_v7 = vmul.f32 %v976_v60, %v423_v61  ;;  %vm487_vm6 = vmor %vm485_vm4, %vm486_vm15  ;;  %v463_v24 = vand.u32 2147483648, %v375_v57 }
 0x310   :  { %v482_v63 = vsub.f32 1.0, %v481_v59  ;;  %v461_v28 = vand.u32 2147483647, %v375_v57  ;;  %vm457_vm9 = vweird.f32 %v375_v57  ;;  %v393_v30 = vand.u32 2147483648, %v1004_v58 }
 0x311   :  { %v469_v0 = vmul.f32 %v809_v51, %v468_v62  ;;  %768 = vmatmul.msk.f32.vlgmr.msrb.gmra.mxu1 %vm103_vm1, %v496_v7  ;;  %v391_v33 = vand.u32 2147483647, %v1004_v58  ;;  %v464_v35 = vor.u32 1.1754944e-38, %v463_v24  ;;  %vm387_vm12 = vweird.f32 %v1004_v58 }
 0x312   :  { %v483_v5 = vmul.f32 %v811_v53, %v482_v63  ;;  %vm462_vm13 = vcmp.eq.f32.partialorder %v461_v28, 8.507059e+37  ;;  %v394_v38 = vor.u32 1.1754944e-38, %v393_v30 }
 0x313   :  { %v470_v8 = vadd.f32 %v809_v51, %v469_v0  ;;  %vm392_vm15 = vcmp.eq.f32.partialorder %v391_v33, 8.507059e+37 }
 0x314   :  { %v813_v10 = vpop.eup %812  ;;  %v484_v13 = vadd.f32 %v811_v53, %v483_v5 }
 0x315   :  { %v474_v14 = vsel %vm473_vm3, %v809_v51, %v470_v8  ;;  %v453_v17 = vmul.f32 %v813_v10, %v375_v57  ;;  %v372_v18 = vpop.xlane.xlu1 %371  ;;  %v815_v19 = vpop.eup %814  ;;  %vm458_vm8 = vweird.f32 %v813_v10 }
 0x316   :  { %v479_v20 = vsel %vm476_vm5, %v478_v12, %v474_v14  ;;  %v488_v21 = vsel %vm487_vm6, %v811_v53, %v484_v13  ;;  %816 = vrcp.f32 %v372_v18  ;;  %v383_v23 = vmul.f32 %v815_v19, %v1004_v58  ;;  %vm459_vm11 = vmor %vm457_vm9, %vm458_vm8 }
 0x317   :  { %v493_v60 = vsel %vm490_vm7, %v492_v16, %v488_v21  ;;  %v454_v22 = vsub.f32 1.0, %v453_v17  ;;  %v500_v25 = vmul.f32 %v980_v2, %v479_v20  ;;  %vm388_vm10 = vweird.f32 %v815_v19 }
 0x318   :  { %v501_v26 = vmul.f32 %v982_v4, %v493_v60  ;;  %v384_v29 = vsub.f32 1.0, %v383_v23  ;;  %vm389_vm14 = vmor %vm387_vm12, %vm388_vm10  ;;  %v449_v43 = vand.u32 2147483648, %v372_v18  ;;  %v447_v45 = vand.u32 2147483647, %v372_v18 }
 0x319   :  { %v455_v27 = vmul.f32 %v813_v10, %v454_v22  ;;  %772 = vmatmul.msk.f32.vlgmr.msra.gmra.mxu1 %vm103_vm1, %v500_v25  ;;  %vm443_vm3 = vweird.f32 %v372_v18  ;;  %vm707_vm6 = vcmask 130048   ;;  %vm709_vm7 = vcmask 195584  }
 0x31a   :  { %773 = vmatmul.msk.f32.vlgmr.msra.gmra.mxu2 %vm103_vm1, %v501_v26  ;;  %v385_v32 = vmul.f32 %v815_v19, %v384_v29  ;;  %v450_v48 = vor.u32 1.1754944e-38, %v449_v43  ;;  %vm448_vm5 = vcmp.eq.f32.partialorder %v447_v45, 8.507059e+37 }
 0x31b   :  { %v456_v31 = vadd.f32 %v813_v10, %v455_v27 }
 0x31c   :  { %v817_v34 = vpop.eup %816  ;;  %v386_v4 = vadd.f32 %v815_v19, %v385_v32 }
 0x31d   :  { %v460_v2 = vsel %vm459_vm11, %v813_v10, %v456_v31  ;;  %v439_v36 = vmul.f32 %v817_v34, %v372_v18  ;;  %vm444_vm2 = vweird.f32 %v817_v34 }
 0x31e   :  { %v465_v37 = vsel %vm462_vm13, %v464_v35, %v460_v2  ;;  %v390_v39 = vsel %vm389_vm14, %v815_v19, %v386_v4  ;;  %vm445_vm4 = vmor %vm443_vm3, %vm444_vm2 }
 0x31f   :  { %v440_v40 = vsub.f32 1.0, %v439_v36  ;;  %v499_v41 = vmul.f32 %v990_v11, %v465_v37  ;;  %v395_v42 = vsel %vm392_vm15, %v394_v38, %v390_v39 }
 0x320   :  { %v494_v46 = vmul.f32 %v988_v9, %v395_v42 }
 0x321   :  { %v441_v44 = vmul.f32 %v817_v34, %v440_v40  ;;  %771 = vmatmul.msk.f32.vlgmr.msra.gmra.mxu0 %vm103_vm1, %v499_v41 }
 0x322   :  { %766 = vmatmul.msk.f32.vlgmr.msra.gmra.mxu3 %vm103_vm1, %v494_v46 }
 0x323   :  { %v442_v47 = vadd.f32 %v817_v34, %v441_v44 }
 0x325   :  { %v446_v49 = vsel %vm445_vm4, %v817_v34, %v442_v47 }
 0x326   :  { %v451_v50 = vsel %vm448_vm5, %v450_v48, %v446_v49 }
 0x327   :  { %v498_v11 = vmul.f32 %v996_v15, %v451_v50 }
 0x32a   :  { %770 = vmatmul.msk.f32.vlgmr.msrb.gmra.mxu3 %vm103_vm1, %v498_v11 }
 0x386   :  { %v547_v51 = vpop.f32.mrf.mxu0  ;;  %v595_v53 = vpop.f32.mrf.mxu2 }
 0x387   :  { %695 = vrot.lane.b32.xlu2 %v547_v51, %s898_s21 }
 0x38e   :  { %v571_v9 = vpop.f32.mrf.mxu1 }
 0x38f   :  { %703 = vrot.lane.b32.xlu2 %v595_v53, %s904_s2  ;;  %699 = vrot.lane.b32.xlu1 %v571_v9, %s905_s28 }
 0x396   :  { %v667_v56 = vpop.f32.mrf.mxu1 }
 0x39d   :  { %v691_v54 = vpop.f32.mrf.mxu2 }
 0x39e   :  { %720 = vrot.lane.b32.xlu1 %v691_v54, %s904_s2  ;;  %v643_v55 = vpop.f32.mrf.mxu0 }
 0x39f   :  { %712 = vrot.lane.b32.xlu0 %v643_v55, %s898_s21 }
 0x3a5   :  { %v523_v15 = vpop.f32.mrf.mxu3 }
 0x3a7   :  { %716 = vrot.lane.b32.xlu0 %v667_v56, %s905_s28 }
 0x3ad   :  { %v619_v0 = vpop.f32.mrf.mxu3 }
 0x3e1   :  { %v696_v57 = vpop.permute.xlu2 %695 }
 0x3e2   :  { %v706_v58 = vsel %vm103_vm1, %v523_v15, %v696_v57 }
 0x3e9   :  { %v704_v61 = vpop.permute.xlu2 %703 }
 0x401   :  { %v700_v59 = vpop.permute.xlu1 %699 }
 0x402   :  { %v708_v62 = vsel %vm707_vm6, %v706_v58, %v700_v59 }
 0x403   :  { %v710_v52 = vsel %vm709_vm7, %v708_v62, %v704_v61 }
 0x404   :  { %726 = vst.msk [vmem:[#allocation7] sm:$0xff] %vm57_vm0, %v710_v52 }
 0x410   :  { %v721_v5 = vpop.permute.xlu1 %720 }
 0x411   :  { %v713_v63 = vpop.permute.xlu0 %712 }
 0x412   :  { %v723_v1 = vsel %vm103_vm1, %v619_v0, %v713_v63 }
 0x419   :  { %v717_v3 = vpop.permute.xlu0 %716 }
 0x41a   :  { %v724_v6 = vsel %vm707_vm6, %v723_v1, %v717_v3 }
 0x41b   :  { %v725_v7 = vsel %vm709_vm7, %v724_v6, %v721_v5 }
 0x41c   :  { %727 = vst.msk [vmem:[#allocation7 + $0x8] sm:$0xff] %vm57_vm0, %v725_v7 }
 0x41d   :  { %740 = dma.vmem_to_hbm [thread:$0]  %s733_s30, 256, %s735_s6, [#allocation4], %s897_s20, %s897_s20, %s898_s21  }
 0x41e   :  { %894 = dma.done.wait [#allocation4], 256  }
 0x41f   :  { %895 = vsyncadd [#allocation4], 4294967040 }
 0x420   :  { %745 = vsyncpa [#allocation3], 1 }
 0x421   :  { %746 = vsyncpa [#allocation6], 1 }
 0x422   :  { %747 = vsyncpa [#allocation4], 1 }

</bundles_post_ra>
